<compile_context>
chip_gen: v7x
topology: tpu7x:2x2x1
jax: 0.10.0
libtpu: 0.0.40
codegen_flags: <defaults>
</compile_context>

<pallas_src>
import functools

import jax
import jax.numpy as jnp
from jax import lax
from jax.experimental import pallas as pl
from jax.experimental.pallas import tpu as pltpu


# ---------------------------------------------------------------------------
# Kernels
# ---------------------------------------------------------------------------

def _logits_kernel(idx_ref, table_ref, logits_ref):
    """Inference path: embedding lookup only (no CE work, no target input)."""
    block_n, V = logits_ref.shape
    idx = idx_ref[...]                                        # (block_n, 1) i32
    col = lax.broadcasted_iota(jnp.int32, (block_n, V), 1)
    onehot = (col == idx).astype(jnp.float32)                 # (block_n, V)
    logits_ref[...] = jnp.dot(onehot, table_ref[...],
                              preferred_element_type=jnp.float32,
                              precision=lax.Precision.HIGHEST)


def _logits_loss_kernel(idx_ref, tgt_ref, table_ref, logits_ref, loss_ref,
                        *, n_valid, inv_n):
    """Training path: embedding lookup + block-reduced cross-entropy partial."""
    block_n, V = logits_ref.shape
    row0 = pl.program_id(0) * block_n

    idx = idx_ref[...]                                        # (block_n, 1) i32
    tgt = tgt_ref[...]                                        # (block_n, 1) i32

    col = lax.broadcasted_iota(jnp.int32, (block_n, V), 1)
    onehot = (col == idx).astype(jnp.float32)                 # (block_n, V)

    logits = jnp.dot(onehot, table_ref[...],
                     preferred_element_type=jnp.float32,
                     precision=lax.Precision.HIGHEST)         # (block_n, V)
    logits_ref[...] = logits

    # Cross-entropy per row (max-stabilized logsumexp - target logit).
    m = jnp.max(logits, axis=-1, keepdims=True)                         # (bn,1)
    lse = m + jnp.log(jnp.sum(jnp.exp(logits - m), axis=-1, keepdims=True))
    tgt_logit = jnp.sum(jnp.where(col == tgt, logits, 0.0),
                        axis=-1, keepdims=True)                         # (bn,1)
    per_row = (lse - tgt_logit) * inv_n                                 # (bn,1)

    # Mask rows beyond N (trailing partial block reads undefined idx/tgt; the
    # corresponding logits rows are masked by Pallas on writeback, and this
    # mask removes them from the loss).
    row_ids = row0 + lax.broadcasted_iota(jnp.int32, (block_n, 1), 0)
    per_row = jnp.where(row_ids < n_valid, per_row, 0.0)

    # In-kernel reduction -> one lane-dense partial sum per grid step.
    block_sum = jnp.sum(per_row)                                        # scalar
    loss_ref[...] = jnp.broadcast_to(block_sum, loss_ref.shape)         # (1,1,V)


# ---------------------------------------------------------------------------
# pallas_call wrappers
# ---------------------------------------------------------------------------

@functools.partial(jax.jit, static_argnames=("block_n",))
def _forward_logits(idx_col, table, *, block_n):
    n = idx_col.shape[0]
    V = table.shape[0]
    grid = (pl.cdiv(n, block_n),)
    return pl.pallas_call(
        _logits_kernel,
        grid=grid,
        in_specs=[
            pl.BlockSpec((block_n, 1), lambda i: (i, 0)),
            pl.BlockSpec((V, V), lambda i: (0, 0)),       # table resident
        ],
        out_specs=pl.BlockSpec((block_n, V), lambda i: (i, 0)),
        out_shape=jax.ShapeDtypeStruct((n, V), jnp.float32),
        compiler_params=pltpu.CompilerParams(
            dimension_semantics=("parallel",)),
    )(idx_col, table)


@functools.partial(jax.jit, static_argnames=("block_n", "n_valid"))
def _forward_logits_loss(idx_col, tgt_col, table, *, block_n, n_valid):
    n = idx_col.shape[0]
    V = table.shape[0]
    num_blocks = pl.cdiv(n, block_n)
    kernel = functools.partial(_logits_loss_kernel,
                               n_valid=n_valid, inv_n=1.0 / n_valid)
    logits, loss_parts = pl.pallas_call(
        kernel,
        grid=(num_blocks,),
        in_specs=[
            pl.BlockSpec((block_n, 1), lambda i: (i, 0)),
            pl.BlockSpec((block_n, 1), lambda i: (i, 0)),
            pl.BlockSpec((V, V), lambda i: (0, 0)),       # table resident
        ],
        out_specs=(
            pl.BlockSpec((block_n, V), lambda i: (i, 0)),
            pl.BlockSpec((1, 1, V), lambda i: (i, 0, 0)),
        ),
        out_shape=(
            jax.ShapeDtypeStruct((n, V), jnp.float32),
            jax.ShapeDtypeStruct((num_blocks, 1, V), jnp.float32),
        ),
        compiler_params=pltpu.CompilerParams(
            dimension_semantics=("parallel",)),
    )(idx_col, tgt_col, table)
    # Per-step partials are already masked and scaled by 1/N inside the kernel;
    # summing lane 0 of each step gives the exact mean cross-entropy.
    return logits, jnp.sum(loss_parts[:, 0, 0])


# ---------------------------------------------------------------------------
# Module-equivalent forward
# ---------------------------------------------------------------------------

_MAX_BLOCK_N = 2048  # rows/tile -> 1 MiB lane-dense logits tile; ~6 MiB total
                     # VMEM with double buffering (safe on v5e/v6e/v7x).


def bigram_forward(idx, table, targets=None):
    """Mirrors BigramLanguageModel.forward.

    Returns (logits, loss):
      - targets is None:  logits shape (B, T, V), loss None
      - targets given:    logits shape (B*T, V), loss scalar (mean CE)
    """
    B, T = idx.shape
    V = table.shape[0]
    N = B * T
    # Single full-extent block for small N, 2048-row tiles otherwise.  Partial
    # trailing blocks are handled by Pallas output masking + the in-kernel
    # n_valid mask, so no host-side padding / slicing is needed.
    block_n = min(N, _MAX_BLOCK_N)

    idx_col = idx.reshape(N, 1).astype(jnp.int32)

    if targets is None:
        logits = _forward_logits(idx_col, table, block_n=block_n)
        return logits.reshape(B, T, V), None

    tgt_col = targets.reshape(N, 1).astype(jnp.int32)
    logits, loss = _forward_logits_loss(idx_col, tgt_col, table,
                                        block_n=block_n, n_valid=N)
    return logits, loss


# TODO(synk): generate() (autoregressive multinomial sampling loop) is host-side
# control flow and is not expressed as a single fixed-shape Pallas kernel.


if __name__ == "__main__":
    V = 128      # vocab_size (lane-dense)
    B, T = 2, 8  # batch, sequence length  -> N = 16 rows

    key = jax.random.PRNGKey(0)
    k_tab, k_idx, k_tgt = jax.random.split(key, 3)

    # nn.Embedding(vocab_size, vocab_size) weights ~ N(0, 1)
    table = jax.random.normal(k_tab, (V, V), dtype=jnp.float32)
    idx = jax.random.randint(k_idx, (B, T), 0, V, dtype=jnp.int32)
    targets = jax.random.randint(k_tgt, (B, T), 0, V, dtype=jnp.int32)

    # Training path: flattened logits + scalar mean cross-entropy.
    logits, loss = bigram_forward(idx, table, targets)
    jax.block_until_ready((logits, loss))

    # Inference path: (B, T, V) logits, no loss, no CE work compiled in.
    logits_nt, loss_nt = bigram_forward(idx, table, None)
    jax.block_until_ready(logits_nt)

    # Correctness check against a pure-JAX reference.
    ref_logits = table[idx.reshape(-1)]                              # (N, V)
    ref_lse = jax.scipy.special.logsumexp(ref_logits, axis=-1)
    ref_loss = jnp.mean(
        ref_lse - ref_logits[jnp.arange(B * T), targets.reshape(-1)])

    assert logits.shape == (B * T, V) and logits_nt.shape == (B, T, V)
    assert loss_nt is None
    assert jnp.allclose(logits, ref_logits, atol=1e-5)
    assert jnp.allclose(logits_nt.reshape(B * T, V), ref_logits, atol=1e-5)
    assert jnp.allclose(loss, ref_loss, atol=1e-5)

    # Exercise the no-padding path with a row count that is not a multiple of 8
    # (full-extent block) on both branches.
    B2, T2 = 3, 5
    idx2 = jax.random.randint(jax.random.PRNGKey(1), (B2, T2), 0, V, jnp.int32)
    tgt2 = jax.random.randint(jax.random.PRNGKey(2), (B2, T2), 0, V, jnp.int32)
    logits2, loss2 = bigram_forward(idx2, table, tgt2)
    jax.block_until_ready((logits2, loss2))
    ref2 = table[idx2.reshape(-1)]
    ref2_lse = jax.scipy.special.logsumexp(ref2, axis=-1)
    ref2_loss = jnp.mean(
        ref2_lse - ref2[jnp.arange(B2 * T2), tgt2.reshape(-1)])
    assert jnp.allclose(logits2, ref2, atol=1e-5)
    assert jnp.allclose(loss2, ref2_loss, atol=1e-5)

    print("KERNEL_OK")
</pallas_src>

<mosaic_0001>
module attributes {stable_mosaic.version = 11 : i64} {
  func.func @_logits_loss_kernel(%arg0: i32, %arg1: memref<16x1xi32, #tpu.memory_space<vmem>>, %arg2: memref<16x1xi32, #tpu.memory_space<vmem>>, %arg3: memref<128x128xf32, #tpu.memory_space<vmem>>, %arg4: memref<16x128xf32, #tpu.memory_space<vmem>>, %arg5: memref<1x1x128xf32, #tpu.memory_space<vmem>>) attributes {dimension_semantics = [#tpu.dimension_semantics<parallel>], iteration_bounds = array<i64: 1>, scalar_prefetch = 0 : i64, scratch_operands = 0 : i64, tpu.core_type = #tpu.core_type<tc>, window_params = [{transform_indices = @transform_0, window_bounds = array<i64: 16, 1>}, {transform_indices = @transform_1, window_bounds = array<i64: 16, 1>}, {pipeline_mode = #tpu.pipeline_mode<synchronous>, transform_indices = @transform_2, window_bounds = array<i64: 128, 128>}, {transform_indices = @transform_3, window_bounds = array<i64: 16, 128>}, {transform_indices = @transform_4, window_bounds = array<i64: 1, 1, 128>}]} {
    %c16_i32 = arith.constant 16 : i32
    %0 = arith.muli %arg0, %c16_i32 : i32
    %c0 = arith.constant 0 : index
    %c0_0 = arith.constant 0 : index
    %1 = vector.load %arg1[%c0, %c0_0] : memref<16x1xi32, #tpu.memory_space<vmem>>, vector<16x1xi32>
    %c0_1 = arith.constant 0 : index
    %c0_2 = arith.constant 0 : index
    %2 = vector.load %arg2[%c0_1, %c0_2] : memref<16x1xi32, #tpu.memory_space<vmem>>, vector<16x1xi32>
    %3 = tpu.iota {dimensions = array<i32: 1>} : vector<16x128xi32>
    %4 = vector.broadcast %1 : vector<16x1xi32> to vector<16x128xi32>
    %5 = arith.cmpi eq, %3, %4 : vector<16x128xi32>
    %6 = arith.extui %5 : vector<16x128xi1> to vector<16x128xi32>
    %7 = arith.sitofp %6 : vector<16x128xi32> to vector<16x128xf32>
    %c0_3 = arith.constant 0 : index
    %c0_4 = arith.constant 0 : index
    %8 = vector.load %arg3[%c0_3, %c0_4] : memref<128x128xf32, #tpu.memory_space<vmem>>, vector<128x128xf32>
    %cst = arith.constant dense<0.000000e+00> : vector<16x128xf32>
    %9 = tpu.matmul %7, %8, %cst {dimension_numbers = #tpu.dot_dimension_numbers<[1], [0], [0], [1], [0, 0, 1, 1], [], []>, precision = #tpu.contract_precision<fp32>} : vector<16x128xf32>, vector<128x128xf32>, vector<16x128xf32> -> vector<16x128xf32>
    %c0_5 = arith.constant 0 : index
    %c0_6 = arith.constant 0 : index
    %10 = vector.load %arg4[%c0_5, %c0_6] : memref<16x128xf32, #tpu.memory_space<vmem>>, vector<16x128xf32>
    tpu.vector_store %arg4[%c0_5, %c0_6], %9 {strides = array<i32>} : memref<16x128xf32, #tpu.memory_space<vmem>>, vector<16x128xf32>,
    %cst_7 = arith.constant dense<0xFF800000> : vector<16xf32>
    %11 = vector.multi_reduction <maximumf>, %9, %cst_7 [1] : vector<16x128xf32> to vector<16xf32>
    %12 = vector.shape_cast %11 : vector<16xf32> to vector<16x1xf32>
    %13 = vector.broadcast %12 : vector<16x1xf32> to vector<16x128xf32>
    %14 = arith.subf %9, %13 : vector<16x128xf32>
    %15 = math.exp %14 : vector<16x128xf32>
    %cst_8 = arith.constant dense<0.000000e+00> : vector<16xf32>
    %16 = vector.multi_reduction <add>, %15, %cst_8 [1] : vector<16x128xf32> to vector<16xf32>
    %17 = vector.shape_cast %16 : vector<16xf32> to vector<16x1xf32>
    %18 = math.log %17 : vector<16x1xf32>
    %19 = arith.addf %12, %18 : vector<16x1xf32>
    %20 = vector.broadcast %2 : vector<16x1xi32> to vector<16x128xi32>
    %21 = arith.cmpi eq, %3, %20 : vector<16x128xi32>
    %cst_9 = arith.constant 0.000000e+00 : f32
    %22 = vector.broadcast %cst_9 : f32 to vector<16x128xf32>
    %23 = arith.select %21, %9, %22 : vector<16x128xi1>, vector<16x128xf32>
    %cst_10 = arith.constant dense<0.000000e+00> : vector<16xf32>
    %24 = vector.multi_reduction <add>, %23, %cst_10 [1] : vector<16x128xf32> to vector<16xf32>
    %25 = vector.shape_cast %24 : vector<16xf32> to vector<16x1xf32>
    %26 = arith.subf %19, %25 : vector<16x1xf32>
    %cst_11 = arith.constant 6.250000e-02 : f32
    %27 = vector.broadcast %cst_11 : f32 to vector<16x1xf32>
    %28 = arith.mulf %26, %27 : vector<16x1xf32>
    %29 = tpu.iota {dimensions = array<i32: 0>} : vector<16x1xi32>
    %30 = vector.broadcast %0 : i32 to vector<16x1xi32>
    %31 = arith.addi %30, %29 : vector<16x1xi32>
    %c16_i32_12 = arith.constant 16 : i32
    %32 = vector.broadcast %c16_i32_12 : i32 to vector<16x1xi32>
    %33 = arith.cmpi slt, %31, %32 : vector<16x1xi32>
    %cst_13 = arith.constant 0.000000e+00 : f32
    %34 = vector.broadcast %cst_13 : f32 to vector<16x1xf32>
    %35 = arith.select %33, %28, %34 : vector<16x1xi1>, vector<16x1xf32>
    %36 = vector.shape_cast %35 : vector<16x1xf32> to vector<1x16x1xf32>
    %cst_14 = arith.constant dense<0.000000e+00> : vector<1xf32>
    %37 = vector.multi_reduction <add>, %36, %cst_14 [1, 2] : vector<1x16x1xf32> to vector<1xf32>
    %38 = vector.shape_cast %37 : vector<1xf32> to vector<1x1x1xf32>
    %39 = vector.extract %38[0, 0, 0] : f32 from vector<1x1x1xf32>
    %40 = vector.broadcast %39 : f32 to vector<1x1x128xf32>
    %c0_15 = arith.constant 0 : index
    %c0_16 = arith.constant 0 : index
    %c0_17 = arith.constant 0 : index
    %41 = vector.load %arg5[%c0_15, %c0_16, %c0_17] : memref<1x1x128xf32, #tpu.memory_space<vmem>>, vector<1x1x128xf32>
    tpu.vector_store %arg5[%c0_15, %c0_16, %c0_17], %40 {strides = array<i32>} : memref<1x1x128xf32, #tpu.memory_space<vmem>>, vector<1x1x128xf32>,
    return
  }
  func.func @transform_0(%arg0: i32) -> (i32, i32) {
    %c0_i32 = arith.constant 0 : i32
    %c0_i32_0 = arith.constant 0 : i32
    return %arg0, %c0_i32 : i32, i32
  }
  func.func @transform_1(%arg0: i32) -> (i32, i32) {
    %c0_i32 = arith.constant 0 : i32
    %c0_i32_0 = arith.constant 0 : i32
    return %arg0, %c0_i32 : i32, i32
  }
  func.func @transform_2(%arg0: i32) -> (i32, i32) {
    %c0_i32 = arith.constant 0 : i32
    %c0_i32_0 = arith.constant 0 : i32
    %c0_i32_1 = arith.constant 0 : i32
    return %c0_i32, %c0_i32_0 : i32, i32
  }
  func.func @transform_3(%arg0: i32) -> (i32, i32) {
    %c0_i32 = arith.constant 0 : i32
    %c0_i32_0 = arith.constant 0 : i32
    return %arg0, %c0_i32 : i32, i32
  }
  func.func @transform_4(%arg0: i32) -> (i32, i32, i32) {
    %c0_i32 = arith.constant 0 : i32
    %c0_i32_0 = arith.constant 0 : i32
    %c0_i32_1 = arith.constant 0 : i32
    return %arg0, %c0_i32, %c0_i32_0 : i32, i32, i32
  }
}

</mosaic_0001>

<bundles_post_ra>
// kernel: _forward_logits_loss.1
= control target key start
LH: loop header
LB: loop body
LE: loop exit
PB: predicated region body
PF: predicated region fallthrough
CT: control target
= control target key end

     0   :  { %10 = vsyncpa [#allocation3], 0  ;;  %s1812_s0 = inlined_call_operand.vmem [shape: s32[16,1], index: 0, kind: input, shape index: {}]   ;;  %s1813_s1 = inlined_call_operand.vmem [shape: s32[16,1], index: 1, kind: input, shape index: {}]   ;;  %s1814_s2 = inlined_call_operand.hbm [shape: f32[128,128], index: 2, kind: input, shape index: {}]   ;;  %s1815_s3 = inlined_call_operand.hbm [shape: f32[16,128], index: 3, kind: output, shape index: {0}]   ;;  %s1816_s4 = inlined_call_operand.hbm [shape: f32[1,1,128], index: 4, kind: output, shape index: {1}]  }
   0x1   :  { %11 = vsyncpa [#allocation4], 0 }
   0x2   :  { %12 = vsyncpa [#allocation7], 0  ;;  %s1467_s15 = smov [#allocation2]   ;;  %s1395_s19 = scalar_lea.hbm %s1814_s2, 2048 }
   0x3   :  { %s22_s16 = sshll.u32 %s1467_s15, 4  ;;  %p1396_p0 = scmp.ne.s32.totalorder %s1814_s2, %s1395_s19  ;;  %s23_s16 = int_to_ptr.vmem [resolvable:$true] %s22_s16 }
   0x4   :  { %p1399_p1 = scmp.lt.u32.totalorder %s1395_s19, %s1814_s2 }
   0x6   :  { %p1401_p2 = pnand %p1399_p1, %p1396_p0 }
   0x8   :  { %1404 = shalt.err (!%p1401_p2)
}
   0x9   :  { %s1405_s24 = scalar_lea.vmem %s23_s16, 2048  ;;  %p1410_p4 = scmp.lt.s32.totalorder %s23_s16, %s23_s16 }
   0xa   :  { %p1406_p3 = scmp.ne.s32.totalorder %s23_s16, %s1405_s24  ;;  %p1411_p5 = scmp.lt.s32.totalorder %s1405_s24, %s1405_s24 }
   0xc   :  { %p1412_p6 = por %p1411_p5, %p1410_p4 }
   0xe   :  { %p1413_p7 = pnand %p1412_p6, %p1406_p3 }
  0x10   :  { %1416 = shalt.err (!%p1413_p7)
}
  0x11   :  { %s1468_s25 = smov 128   ;;  %s1469_s26 = smov 8  }
  0x12   :  { %28 = dma.hbm_to_vmem [thread:$0]  %s1814_s2, 2048, %s23_s16, [#allocation3], %s1468_s25, %s1468_s25, %s1469_s26  }
  0x13   :  { %1461 = dma.done.wait [#allocation3], 2048  }
  0x14   :  { %1462 = vsyncadd [#allocation3], 4294965248  ;;  %v1470_v0 = vmov 0   ;;  %v33_v1 = vld [vmem:[%s1812_s0] sm:$0xff]  ;;  %v34_v2 = vld [vmem:[%s1812_s0 + $0x8] sm:$0xff]  ;;  %vm801_vm4 = vcmask 7168  }
  0x15   :  { %1385 = vset.pattern.permute.xlu0 %v1470_v0  ;;  %1386 = vset.pattern.permute.xlu1 %v1470_v0  ;;  %v51_v3 = vld [vmem:[#allocation2] sm:$0xff]  ;;  %v52_v4 = vld [vmem:[#allocation2 + $0x8] sm:$0xff]  ;;  %v53_v5 = vld [vmem:[#allocation2 + $0x10] sm:$0xff] }
  0x16   :  { %40 = vperm.xlu0 %1385, %v33_v1   ;;  %v68_v6 = vand.u32 4294901760, %v51_v3  ;;  %v71_v7 = vand.u32 4294901760, %v52_v4  ;;  %v54_v8 = vld [vmem:[#allocation2 + $0x18] sm:$0xff]  ;;  %v74_v9 = vand.u32 4294901760, %v53_v5  ;;  %v55_v10 = vld [vmem:[#allocation2 + $0x20] sm:$0xff]  ;;  %v56_v11 = vld [vmem:[#allocation2 + $0x28] sm:$0xff] }
  0x17   :  { %v77_v12 = vand.u32 4294901760, %v54_v8  ;;  %v80_v14 = vand.u32 4294901760, %v55_v10  ;;  %v83_v15 = vand.u32 4294901760, %v56_v11  ;;  %v57_v17 = vld [vmem:[#allocation2 + $0x30] sm:$0xff]  ;;  %v58_v18 = vld [vmem:[#allocation2 + $0x38] sm:$0xff]  ;;  %v35_v19 = vld [vmem:[%s1813_s1] sm:$0xff] }
  0x18   :  { %v1521_v13 = vpack.c.bf16 %v71_v7, %v68_v6  ;;  %v86_v21 = vand.u32 4294901760, %v57_v17  ;;  %v89_v22 = vand.u32 4294901760, %v58_v18  ;;  %v59_v23 = vld [vmem:[#allocation2 + $0x40] sm:$0xff]  ;;  %v60_v24 = vld [vmem:[#allocation2 + $0x48] sm:$0xff]  ;;  %v1536_v25 = vsub.f32 %v53_v5, %v74_v9  ;;  %v1542_v29 = vld [vmem:[#allocation2 + $0x50] sm:$0xff] }
  0x19   :  { %v1523_v16 = vpack.c.bf16 %v77_v12, %v74_v9  ;;  %v1534_v20 = vpack.c.bf16 %v83_v15, %v80_v14  ;;  %v1538_v26 = vsub.f32 %v54_v8, %v77_v12  ;;  %v92_v27 = vand.u32 4294901760, %v59_v23  ;;  %v1550_v33 = vld [vmem:[#allocation2 + $0x58] sm:$0xff]  ;;  %v1566_v42 = vld [vmem:[#allocation2 + $0x60] sm:$0xff]  ;;  %v1570_v45 = vld [vmem:[#allocation2 + $0x68] sm:$0xff] }
  0x1a   :  { %43 = vperm.xlu0 %1385, %v34_v2   ;;  %1270 = vmatprep.subr.bf16.mxu0 %v1521_v13  ;;  %v95_v28 = vand.u32 4294901760, %v60_v24  ;;  %v185_v30 = vand.u32 4294901760, %v1536_v25  ;;  %v1548_v32 = vpack.c.bf16 %v89_v22, %v86_v21  ;;  %v98_v37 = vand.u32 4294901760, %v1542_v29  ;;  %v1594_v59 = vld [vmem:[#allocation2 + $0x70] sm:$0xff]  ;;  %v66_v62 = vld [vmem:[#allocation2 + $0x78] sm:$0xff] }
  0x1b   :  { %1174 = vmatprep.subr.bf16.mxu1 %v1521_v13  ;;  %1272 = vmatpush3.bf16.msra.mxu0 %v1521_v13  ;;  %v192_v31 = vand.u32 4294901760, %v1538_v26  ;;  %v1557_v38 = vsub.f32 %v55_v10, %v80_v14  ;;  %v1559_v39 = vsub.f32 %v56_v11, %v83_v15  ;;  %v101_v41 = vand.u32 4294901760, %v1550_v33 }
  0x1c   :  { %1176 = vmatpush3.bf16.msra.mxu1 %v1521_v13  ;;  %1274 = vmatprep.subr.bf16.mxu0 %v1523_v16  ;;  %v186_v35 = vsub.f32 %v1536_v25, %v185_v30  ;;  %v1563_v40 = vpack.c.bf16 %v95_v28, %v92_v27  ;;  %v1572_v46 = vsub.f32 %v51_v3, %v68_v6  ;;  %v104_v53 = vand.u32 4294901760, %v1566_v42 }
  0x1d   :  { %1178 = vmatprep.subr.bf16.mxu1 %v1523_v16  ;;  %v1552_v34 = vpack.c.bf16 %v192_v31, %v185_v30  ;;  %v193_v36 = vsub.f32 %v1538_v26, %v192_v31  ;;  %v1574_v47 = vsub.f32 %v52_v4, %v71_v7  ;;  %v199_v48 = vand.u32 4294901760, %v1557_v38 }
  0x1e   :  { %774 = vperm.xlu0 %1385, %v35_v19   ;;  %v187_v43 = vand.u32 4294901760, %v186_v35  ;;  %v206_v49 = vand.u32 4294901760, %v1559_v39  ;;  %v1580_v51 = vsub.f32 %v57_v17, %v86_v21  ;;  %v1582_v52 = vsub.f32 %v58_v18, %v89_v22 }
  0x1f   :  { %1276 = vmatpush3.bf16.msra.mxu0 %v1523_v16  ;;  %v194_v44 = vand.u32 4294901760, %v193_v36  ;;  %v200_v55 = vsub.f32 %v1557_v38, %v199_v48  ;;  %v1591_v57 = vpack.c.bf16 %v101_v41, %v98_v37  ;;  %v107_v58 = vand.u32 4294901760, %v1570_v45 }
  0x20   :  { %1180 = vmatpush3.bf16.msra.mxu1 %v1523_v16  ;;  %1278 = vmatprep.subr.bf16.mxu0 %v1534_v20  ;;  %v1585_v54 = vpack.c.bf16 %v206_v49, %v199_v48  ;;  %v207_v56 = vsub.f32 %v1559_v39, %v206_v49  ;;  %v213_v60 = vand.u32 4294901760, %v1580_v51  ;;  %v220_v61 = vand.u32 4294901760, %v1582_v52 }
  0x21   :  { %1182 = vmatprep.subr.bf16.mxu1 %v1534_v20  ;;  %v1578_v50 = vpack.c.bf16 %v194_v44, %v187_v43  ;;  %v171_v63 = vand.u32 4294901760, %v1572_v46  ;;  %v178_v0 = vand.u32 4294901760, %v1574_v47  ;;  %v201_v1 = vand.u32 4294901760, %v200_v55 }
  0x22   :  { %v208_v2 = vand.u32 4294901760, %v207_v56  ;;  %v1602_v3 = vpack.c.bf16 %v220_v61, %v213_v60  ;;  %v214_v4 = vsub.f32 %v1580_v51, %v213_v60  ;;  %v221_v5 = vsub.f32 %v1582_v52, %v220_v61 }
  0x23   :  { %1280 = vmatpush3.bf16.msra.mxu0 %v1534_v20  ;;  %v1606_v6 = vsub.f32 %v59_v23, %v92_v27  ;;  %v110_v7 = vand.u32 4294901760, %v1594_v59  ;;  %v1611_v9 = vsub.f32 %v60_v24, %v95_v28  ;;  %v113_v10 = vand.u32 4294901760, %v66_v62 }
  0x24   :  { %1184 = vmatpush3.bf16.msra.mxu1 %v1534_v20  ;;  %1282 = vmatprep.subr.bf16.mxu0 %v1548_v32  ;;  %v1609_v8 = vpack.c.bf16 %v208_v2, %v201_v1  ;;  %v215_v11 = vand.u32 4294901760, %v214_v4  ;;  %v222_v12 = vand.u32 4294901760, %v221_v5  ;;  %v1618_v15 = vpack.c.bf16 %v107_v58, %v104_v53 }
  0x25   :  { %1186 = vmatprep.subr.bf16.mxu1 %v1548_v32  ;;  %v227_v14 = vand.u32 4294901760, %v1606_v6  ;;  %v172_v17 = vsub.f32 %v1572_v46, %v171_v63  ;;  %v179_v18 = vsub.f32 %v1574_v47, %v178_v0  ;;  %v234_v19 = vand.u32 4294901760, %v1611_v9 }
  0x26   :  { %v1623_v21 = vpack.c.bf16 %v222_v12, %v215_v11  ;;  %v240_v23 = vsub.f32 %v1542_v29, %v98_v37  ;;  %v247_v24 = vsub.f32 %v1550_v33, %v101_v41  ;;  %v1635_v36 = vpack.c.bf16 %v113_v10, %v110_v7 }
  0x27   :  { %1284 = vmatpush3.bf16.msra.mxu0 %v1548_v32  ;;  %v228_v22 = vsub.f32 %v1606_v6, %v227_v14  ;;  %v1628_v27 = vpack.c.bf16 %v234_v19, %v227_v14  ;;  %v235_v28 = vsub.f32 %v1611_v9, %v234_v19  ;;  %v173_v29 = vand.u32 4294901760, %v172_v17 }
  0x28   :  { %1188 = vmatpush3.bf16.msra.mxu1 %v1548_v32  ;;  %1286 = vmatprep.subr.bf16.mxu0 %v1563_v40  ;;  %v241_v31 = vand.u32 4294901760, %v240_v23  ;;  %v248_v35 = vand.u32 4294901760, %v247_v24  ;;  %v180_v37 = vand.u32 4294901760, %v179_v18  ;;  %v254_v48 = vsub.f32 %v1566_v42, %v104_v53 }
  0x29   :  { %1190 = vmatprep.subr.bf16.mxu1 %v1563_v40  ;;  %v229_v30 = vand.u32 4294901760, %v228_v22  ;;  %v236_v33 = vand.u32 4294901760, %v235_v28  ;;  %v261_v55 = vsub.f32 %v1570_v45, %v107_v58  ;;  %v1301_v1 = vpack.c.bf16 %v178_v0, %v171_v63 }
  0x2a   :  { %v1637_v41 = vpack.c.bf16 %v248_v35, %v241_v31  ;;  %v242_v43 = vsub.f32 %v240_v23, %v241_v31  ;;  %v249_v44 = vsub.f32 %v247_v24, %v248_v35  ;;  %v255_v61 = vand.u32 4294901760, %v254_v48 }
  0x2b   :  { %1288 = vmatpush3.bf16.msra.mxu0 %v1563_v40  ;;  %v1640_v49 = vpack.c.bf16 %v236_v33, %v229_v30  ;;  %v1205_v2 = vpack.c.bf16 %v180_v37, %v173_v29  ;;  %v262_v4 = vand.u32 4294901760, %v261_v55  ;;  %v268_v53 = vsub.f32 %v1594_v59, %v110_v7 }
  0x2c   :  { %1192 = vmatpush3.bf16.msra.mxu1 %v1563_v40  ;;  %1290 = vmatprep.subr.bf16.mxu0 %v1591_v57  ;;  %v243_v56 = vand.u32 4294901760, %v242_v43  ;;  %v250_v60 = vand.u32 4294901760, %v249_v44  ;;  %v256_v42 = vsub.f32 %v254_v48, %v255_v61  ;;  %v275_v45 = vsub.f32 %v66_v62, %v113_v10 }
  0x2d   :  { %1194 = vmatprep.subr.bf16.mxu1 %v1591_v57  ;;  %v1650_v58 = vpack.c.bf16 %v262_v4, %v255_v61  ;;  %v263_v11 = vsub.f32 %v261_v55, %v262_v4  ;;  %v269_v14 = vand.u32 4294901760, %v268_v53  ;;  %v1660_v10 = vpack.c.bf16 %v1574_v47, %v1572_v46 }
  0x2e   :  { %v1647_v5 = vpack.c.bf16 %v250_v60, %v243_v56  ;;  %v257_v12 = vand.u32 4294901760, %v256_v42  ;;  %v276_v17 = vand.u32 4294901760, %v275_v45  ;;  %v1664_v28 = vpack.c.bf16 %v1538_v26, %v1536_v25 }
  0x2f   :  { %1292 = vmatpush3.bf16.msra.mxu0 %v1591_v57  ;;  %v264_v63 = vand.u32 4294901760, %v263_v11  ;;  %v270_v18 = vsub.f32 %v268_v53, %v269_v14  ;;  %v1668_v30 = vpack.c.bf16 %v1559_v39, %v1557_v38  ;;  %v1672_v31 = vpack.c.bf16 %v1582_v52, %v1580_v51 }
  0x30   :  { %1196 = vmatpush3.bf16.msra.mxu1 %v1591_v57  ;;  %1294 = vmatprep.subr.bf16.mxu0 %v1618_v15  ;;  %v1654_v0 = vpack.c.bf16 %v276_v17, %v269_v14  ;;  %v277_v19 = vsub.f32 %v275_v45, %v276_v17  ;;  %v1676_v35 = vpack.c.bf16 %v1611_v9, %v1606_v6  ;;  %v37_v25 = vlaneseq }
  0x31   :  { %1198 = vmatprep.subr.bf16.mxu1 %v1618_v15  ;;  %v1229_v22 = vpack.c.bf16 %v264_v63, %v257_v12  ;;  %v271_v59 = vand.u32 4294901760, %v270_v18  ;;  %v1678_v29 = vpack.c.bf16 %v247_v24, %v240_v23  ;;  %v1680_v46 = vpack.c.bf16 %v261_v55, %v254_v48 }
  0x32   :  { %v278_v62 = vand.u32 4294901760, %v277_v19  ;;  %v1682_v47 = vpack.c.bf16 %v275_v45, %v268_v53  ;;  %v1684_v26 = vand.u32 127, %v37_v25  ;;  %v1471_v38 = vmov 0.0  }
  0x33   :  { %1296 = vmatpush3.bf16.msra.mxu0 %v1618_v15  ;;  %v1472_v48 = vmov 1.0  }
  0x34   :  { %1200 = vmatpush3.bf16.msra.mxu1 %v1618_v15  ;;  %1298 = vmatprep.subr.bf16.mxu0 %v1635_v36  ;;  %v1656_v7 = vpack.c.bf16 %v278_v62, %v271_v59 }
  0x35   :  { %1202 = vmatprep.subr.bf16.mxu1 %v1635_v36 }
  0x37   :  { %1300 = vmatpush3.bf16.msra.mxu0 %v1635_v36 }
  0x38   :  { %1204 = vmatpush3.bf16.msra.mxu1 %v1635_v36  ;;  %1302 = vmatprep.subr.bf16.mxu0 %v1301_v1 }
  0x39   :  { %1206 = vmatprep.subr.bf16.mxu1 %v1205_v2 }
  0x95   :  { %v41_v37 = vpop.permute.xlu0 %40 }
  0x96   :  { %vm45_vm0 = vcmp.eq.s32.totalorder %v1684_v26, %v41_v37 }
  0x97   :  { %v847_v39 = vsel %vm45_vm0, 1.0, %v1471_v38 }
  0x98   :  { %v149_v51 = vsub.f32 %v847_v39, %v847_v39 }
  0x99   :  { %v1689_v52 = vpop.permute.xlu0 %43 }
  0x9a   :  { %vm46_vm1 = vcmp.eq.s32.totalorder %v1684_v26, %v1689_v52  ;;  %v150_v6 = vand.u32 4294901760, %v149_v51 }
  0x9b   :  { %v848_v9 = vsel %vm46_vm1, 1.0, %v1471_v38 }
  0x9c   :  { %v1696_v23 = vsub.f32 %v848_v9, %v848_v9  ;;  %1100 = vmatprep.mubr.f32.mxu0 %v150_v6  ;;  %v151_v24 = vsub.f32 %v149_v51, %v150_v6 }
  0x9e   :  { %v152_v33 = vand.u32 4294901760, %v151_v24  ;;  %v160_v43 = vand.u32 4294901760, %v1696_v23 }
  0xa0   :  { %995 = vmatprep.mubr.f32.mxu1 %v152_v33  ;;  %1101 = vmatmul.mubr.f32.vlgmr.msra.gmra.mrb[0].mxu0 %v160_v43  ;;  %v161_v44 = vsub.f32 %v1696_v23, %v160_v43 }
  0xa1   :  { %1304 = vmatpush3.bf16.msra.mxu0 %v1301_v1  ;;  %1135 = vmatprep.mubr.msk.f32.mxu0 %vm45_vm0, %v1472_v48 }
  0xa2   :  { %1306 = vmatprep.subr.bf16.mxu0 %v1552_v34  ;;  %v162_v55 = vand.u32 4294901760, %v161_v44 }
  0xa4   :  { %996 = vmatmul.mubr.f32.vlgmr.msra.gmra.mrb[0].mxu1 %v162_v55 }
  0xa5   :  { %1208 = vmatpush3.bf16.msra.mxu1 %v1205_v2  ;;  %1308 = vmatpush3.bf16.msra.mxu0 %v1552_v34 }
  0xa6   :  { %1030 = vmatprep.mubr.msk.f32.mxu1 %vm45_vm0, %v1472_v48  ;;  %1210 = vmatprep.subr.bf16.mxu1 %v1578_v50 }
  0xa7   :  { %1310 = vmatprep.subr.bf16.mxu0 %v1585_v54 }
  0xa9   :  { %1212 = vmatpush3.bf16.msra.mxu1 %v1578_v50  ;;  %1312 = vmatpush3.bf16.msra.mxu0 %v1585_v54  ;;  %v36_v50 = vld [vmem:[%s1813_s1 + $0x8] sm:$0xff]  ;;  %s1473_s1 = smov [#allocation5]  }
  0xaa   :  { %1214 = vmatprep.subr.bf16.mxu1 %v1609_v8  ;;  %1314 = vmatprep.subr.bf16.mxu0 %v1602_v3  ;;  %s821_s9 = sshll.u32 %s1473_s1, 4  ;;  %s822_s9 = int_to_ptr.vmem [resolvable:$true] %s821_s9 }
  0xab   :  { %s1417_s10 = scalar_lea.vmem %s822_s9, 256  ;;  %p1422_p9 = scmp.lt.s32.totalorder %s822_s9, %s822_s9 }
  0xac   :  { %p1418_p8 = scmp.ne.s32.totalorder %s822_s9, %s1417_s10  ;;  %p1423_p10 = scmp.lt.s32.totalorder %s1417_s10, %s1417_s10 }
  0xad   :  { %1216 = vmatpush3.bf16.msra.mxu1 %v1609_v8  ;;  %1316 = vmatpush3.bf16.msra.mxu0 %v1602_v3 }
  0xae   :  { %1218 = vmatprep.subr.bf16.mxu1 %v1623_v21  ;;  %1318 = vmatprep.subr.bf16.mxu0 %v1628_v27  ;;  %p1424_p11 = por %p1423_p10, %p1422_p9 }
  0xb0   :  { %p1425_p12 = pnand %p1424_p11, %p1418_p8 }
  0xb1   :  { %1220 = vmatpush3.bf16.msra.mxu1 %v1623_v21  ;;  %1320 = vmatpush3.bf16.msra.mxu0 %v1628_v27 }
  0xb2   :  { %1222 = vmatprep.subr.bf16.mxu1 %v1640_v49  ;;  %1322 = vmatprep.subr.bf16.mxu0 %v1637_v41 }
  0xb5   :  { %1224 = vmatpush3.bf16.msra.mxu1 %v1640_v49  ;;  %1324 = vmatpush3.bf16.msra.mxu0 %v1637_v41  ;;  %v775_v41 = vpop.permute.xlu0 %774 }
  0xb6   :  { %1226 = vmatprep.subr.bf16.mxu1 %v1647_v5  ;;  %1326 = vmatprep.subr.bf16.mxu0 %v1650_v58  ;;  %vm779_vm2 = vcmp.eq.s32.totalorder %v1684_v26, %v775_v41 }
  0xb9   :  { %1228 = vmatpush3.bf16.msra.mxu1 %v1647_v5  ;;  %1328 = vmatpush3.bf16.msra.mxu0 %v1650_v58 }
  0xba   :  { %1230 = vmatprep.subr.bf16.mxu1 %v1229_v22  ;;  %1330 = vmatprep.subr.bf16.mxu0 %v1654_v0 }
  0xbd   :  { %1232 = vmatpush3.bf16.msra.mxu1 %v1229_v22  ;;  %1332 = vmatpush3.bf16.msra.mxu0 %v1654_v0 }
  0xbe   :  { %1234 = vmatprep.subr.bf16.mxu1 %v1656_v7  ;;  %1334 = vmatprep.subr.bf16.mxu0 %v1521_v13 }
  0xc0   :  { %1136 = vmatmul.mubr.msk.f32.vlgmr.msra.gmra.mrb[0].mxu0 %vm46_vm1, %v1472_v48 }
  0xc1   :  { %1236 = vmatpush3.bf16.msra.mxu1 %v1656_v7  ;;  %1336 = vmatpush3.bf16.msra.mxu0 %v1521_v13 }
  0xc2   :  { %1170 = vmatprep.mubr.msk.f32.mxu0 %vm45_vm0, %v1472_v48  ;;  %1238 = vmatprep.subr.bf16.mxu1 %v1660_v10 }
  0xc3   :  { %1338 = vmatprep.subr.bf16.mxu0 %v1523_v16 }
  0xc4   :  { %1031 = vmatmul.mubr.msk.f32.vlgmr.msra.gmra.mrb[0].mxu1 %vm46_vm1, %v1472_v48 }
  0xc5   :  { %1240 = vmatpush3.bf16.msra.mxu1 %v1660_v10  ;;  %1065 = vmatprep.mubr.f32.mxu1 %v149_v51 }
  0xc6   :  { %1340 = vmatpush3.bf16.msra.mxu0 %v1523_v16  ;;  %1242 = vmatprep.subr.bf16.mxu1 %v1664_v28 }
  0xc7   :  { %1342 = vmatprep.subr.bf16.mxu0 %v1534_v20 }
  0xc9   :  { %1244 = vmatpush3.bf16.msra.mxu1 %v1664_v28 }
  0xca   :  { %1344 = vmatpush3.bf16.msra.mxu0 %v1534_v20  ;;  %1246 = vmatprep.subr.bf16.mxu1 %v1668_v30 }
  0xcb   :  { %1346 = vmatprep.subr.bf16.mxu0 %v1548_v32 }
  0xcd   :  { %1248 = vmatpush3.bf16.msra.mxu1 %v1668_v30 }
  0xce   :  { %1348 = vmatpush3.bf16.msra.mxu0 %v1548_v32  ;;  %1250 = vmatprep.subr.bf16.mxu1 %v1672_v31 }
  0xcf   :  { %1350 = vmatprep.subr.bf16.mxu0 %v1563_v40 }
  0xd1   :  { %1252 = vmatpush3.bf16.msra.mxu1 %v1672_v31 }
  0xd2   :  { %1352 = vmatpush3.bf16.msra.mxu0 %v1563_v40  ;;  %1254 = vmatprep.subr.bf16.mxu1 %v1676_v35 }
  0xd3   :  { %1354 = vmatprep.subr.bf16.mxu0 %v1591_v57 }
  0xd5   :  { %1256 = vmatpush3.bf16.msra.mxu1 %v1676_v35 }
  0xd6   :  { %1356 = vmatpush3.bf16.msra.mxu0 %v1591_v57  ;;  %1258 = vmatprep.subr.bf16.mxu1 %v1678_v29 }
  0xd7   :  { %1358 = vmatprep.subr.bf16.mxu0 %v1618_v15 }
  0xd9   :  { %1260 = vmatpush3.bf16.msra.mxu1 %v1678_v29 }
  0xda   :  { %1360 = vmatpush3.bf16.msra.mxu0 %v1618_v15  ;;  %1262 = vmatprep.subr.bf16.mxu1 %v1680_v46 }
  0xdb   :  { %1362 = vmatprep.subr.bf16.mxu0 %v1635_v36 }
  0xdd   :  { %1264 = vmatpush3.bf16.msra.mxu1 %v1680_v46 }
  0xde   :  { %1364 = vmatpush3.bf16.msra.mxu0 %v1635_v36  ;;  %1266 = vmatprep.subr.bf16.mxu1 %v1682_v47 }
  0xe1   :  { %1171 = vmatmul.mubr.msk.f32.vlgmr.msra.gmra.mrb[0].mxu0 %vm46_vm1, %v1472_v48  ;;  %1268 = vmatpush3.bf16.msra.mxu1 %v1682_v47 }
  0xe4   :  { %1066 = vmatmul.mubr.f32.vlgmr.msra.gmra.mrb[0].mxu1 %v1696_v23 }
 0x1b4   :  { %v1172_v13 = vpop.f32.mrb[0].mxu0 }
 0x1b5   :  { %v741_v16 = vpop.f32.mrb[1].mxu0 }
 0x1b7   :  { %v1067_v20 = vpop.f32.mrb[0].mxu1 }
 0x1b8   :  { %v1365_v32 = vadd.f32 %v1172_v13, %v1067_v20  ;;  %v425_v34 = vpop.f32.mrb[1].mxu1 }
 0x1b9   :  { %v1366_v40 = vadd.f32 %v741_v16, %v425_v34 }
 0x1ba   :  { %752 = vst [vmem:[#allocation5 + $0x8] sm:$0xff] %v1365_v32  ;;  %755 = vmax.xlane.f32.xlu1 %v1365_v32 }
 0x1bb   :  { %751 = vst [vmem:[#allocation5] sm:$0xff] %v1366_v40  ;;  %v781_v56 = vsel %vm779_vm2, %v1366_v40, 0.0 }
 0x1be   :  { %753 = vmax.xlane.f32.xlu1 %v1366_v40 }
 0x1cf   :  { %777 = vperm.xlu1 %1386, %v36_v50  }
 0x247   :  { %v756_v54 = vpop.xlane.xlu1 %755 }
 0x248   :  { %v758_v57 = vsub.f32 %v1365_v32, %v756_v54 }
 0x24a   :  { %v761_v3 = vmul.f32 1.442695, %v758_v57 }
 0x24b   :  { %v754_v8 = vpop.xlane.xlu1 %753 }
 0x24c   :  { %1387 = vpow2.f32 %v761_v3  ;;  %v757_v15 = vsub.f32 %v1366_v40, %v754_v8 }
 0x24e   :  { %v759_v21 = vmul.f32 1.442695, %v757_v15 }
 0x24f   :  { %v778_v49 = vpop.permute.xlu1 %777 }
 0x250   :  { %1389 = vpow2.f32 %v759_v21  ;;  %vm780_vm3 = vcmp.eq.s32.totalorder %v1684_v26, %v778_v49 }
 0x251   :  { %v782_v60 = vsel %vm780_vm3, %v1365_v32, 0.0 }
 0x256   :  { %v1388_v27 = vpop.eup %1387 }
 0x257   :  { %765 = vadd.xlane.f32.xlu1 %v1388_v27 }
 0x25a   :  { %v1390_v36 = vpop.eup %1389 }
 0x25b   :  { %763 = vadd.xlane.f32.xlu0 %v1390_v36 }
 0x25f   :  { %783 = vadd.xlane.f32.xlu0 %v781_v56 }
 0x263   :  { %785 = vadd.xlane.f32.xlu0 %v782_v60 }
 0x2e4   :  { %v766_v61 = vpop.xlane.xlu1 %765 }
 0x2e5   :  { %1391 = vlog2.f32 %v766_v61 }
 0x2e8   :  { %v764_v1 = vpop.xlane.xlu0 %763 }
 0x2e9   :  { %1393 = vlog2.f32 %v764_v1 }
 0x2ec   :  { %v784_v2 = vpop.xlane.xlu0 %783 }
 0x2ef   :  { %v1392_v4 = vpop.eup %1391 }
 0x2f0   :  { %v770_v5 = vmul.f32 0.6931472, %v1392_v4  ;;  %v786_v45 = vpop.xlane.xlu0 %785 }
 0x2f2   :  { %v772_v42 = vadd.f32 %v770_v5, %v756_v54 }
 0x2f3   :  { %v1394_v53 = vpop.eup %1393 }
 0x2f4   :  { %v768_v58 = vmul.f32 0.6931472, %v1394_v53  ;;  %v788_v11 = vsub.f32 %v772_v42, %v786_v45 }
 0x2f6   :  { %v771_v12 = vadd.f32 %v768_v58, %v754_v8  ;;  %v790_v17 = vmul.f32 0.0625, %v788_v11 }
 0x2f8   :  { %v787_v14 = vsub.f32 %v771_v12, %v784_v2  ;;  %v803_v18 = vsel %vm801_vm4, %v790_v17, 0.0 }
 0x2fa   :  { %v789_v63 = vmul.f32 0.0625, %v787_v14 }
 0x2fc   :  { %v802_v0 = vsel %vm801_vm4, %v789_v63, 0.0 }
 0x2fd   :  { %v804_v19 = vadd.f32 %v803_v18, %v802_v0 }
 0x2ff   :  { %805 = vadd.xlane.f32.xlu0 %v804_v19 }
 0x300   :  { %1428 = shalt.err (!%p1425_p12)
}
 0x301   :  { %s1429_s13 = scalar_lea.hbm %s1815_s3, 256 }
 0x302   :  { %p1430_p13 = scmp.ne.s32.totalorder %s1815_s3, %s1429_s13  ;;  %p1433_p0 = scmp.lt.u32.totalorder %s1429_s13, %s1815_s3 }
 0x304   :  { %p1435_p1 = pnand %p1433_p0, %p1430_p13 }
 0x306   :  { %1438 = shalt.err (!%p1435_p1)
}
 0x307   :  { %827 = dma.vmem_to_hbm [thread:$0]  %s822_s9, 256, %s1815_s3, [#allocation4], %s1468_s25, %s1468_s25, %s1469_s26  }
 0x308   :  { %s1474_s20 = smov [#allocation6]  }
 0x309   :  { %s834_s21 = sshll.u32 %s1474_s20, 4  ;;  %s835_s21 = int_to_ptr.vmem [resolvable:$true] %s834_s21 }
 0x30a   :  { %s1439_s23 = scalar_lea.vmem %s835_s21, 16  ;;  %s1443_s24 = scalar_lea.vmem %s835_s21, 32 }
 0x30b   :  { %p1440_p2 = scmp.ne.s32.totalorder %s835_s21, %s1439_s23  ;;  %p1444_p3 = scmp.lt.s32.totalorder %s835_s21, %s835_s21 }
 0x30c   :  { %p1445_p4 = scmp.lt.s32.totalorder %s1443_s24, %s1439_s23 }
 0x30e   :  { %p1446_p5 = por %p1445_p4, %p1444_p3 }
 0x310   :  { %p1447_p6 = pnand %p1446_p5, %p1440_p2 }
 0x38c   :  { %v806_v22 = vpop.xlane.xlu0 %805 }
 0x38d   :  { %v807_v59 = vrot.slane %v806_v22, 4 }
 0x38f   :  { %v808_v62 = vadd.f32 %v807_v59, %v806_v22 }
 0x391   :  { %v809_v7 = vrot.slane %v808_v62, 2 }
 0x393   :  { %v810_v10 = vadd.f32 %v809_v7, %v808_v62 }
 0x395   :  { %v811_v28 = vrot.slane %v810_v10, 1 }
 0x397   :  { %v812_v30 = vadd.f32 %v811_v28, %v810_v10 }
 0x399   :  { %1375 = vpush %v812_v30 }
 0x3ca   :  { %s1376_s22 = spop %1375 }
 0x3cb   :  { %v814_v31 = vstv %s1376_s22 }
 0x3cc   :  { %815 = vst [vmem:[#allocation6] sm:$0x1] %v814_v31 }
 0x3cd   :  { %1450 = shalt.err (!%p1447_p6)
}
 0x3ce   :  { %s1451_s26 = scalar_lea.hbm %s1816_s4, 16 }
 0x3cf   :  { %p1452_p7 = scmp.ne.s32.totalorder %s1816_s4, %s1451_s26  ;;  %p1455_p8 = scmp.lt.u32.totalorder %s1451_s26, %s1816_s4 }
 0x3d1   :  { %p1457_p9 = pnand %p1455_p8, %p1452_p7 }
 0x3d3   :  { %1460 = shalt.err (!%p1457_p9)
}
 0x3d4   :  { %837 = dma.vmem_to_hbm [thread:$0]  %s835_s21, 16, %s1816_s4, [#allocation7]  }
 0x3d5   :  { %1463 = dma.done.wait [#allocation4], 256  }
 0x3d6   :  { %1464 = vsyncadd [#allocation4], 4294967040 }
 0x3d7   :  { %1465 = dma.done.wait [#allocation7], 16  }
 0x3d8   :  { %1466 = vsyncadd [#allocation7], 4294967280 }
 0x3d9   :  { %844 = vsyncpa [#allocation3], 1 }
 0x3da   :  { %845 = vsyncpa [#allocation4], 1 }
 0x3db   :  { %846 = vsyncpa [#allocation7], 1 }

</bundles_post_ra>
